<compile_context>
chip_gen: v5e
topology: v5e:2x2
jax: 0.10.0
libtpu: 0.0.40
codegen_flags: <defaults>
</compile_context>

<pallas_src>
import jax
import jax.numpy as jnp
from jax.experimental import pallas as pl
from jax.experimental.pallas import tpu as pltpu

INPUT_SIZE = 10
OUTPUT_SIZE = 5


def _round_up(x: int, m: int) -> int:
    return ((x + m - 1) // m) * m


def linear_kernel(x_ref, w_ref, b_ref, o_ref):
    # x_ref: (TB, INPUT_SIZE), w_ref: (INPUT_SIZE, OUTPUT_SIZE) [already transposed
    # in the wrapper], b_ref: (1, OUTPUT_SIZE), o_ref: (TB, OUTPUT_SIZE).
    x = x_ref[...]
    w = w_ref[...]
    b = b_ref[...]
    # y = x @ W^T + b in torch terms; W^T was materialized once outside the kernel.
    y = jnp.dot(x, w, preferred_element_type=jnp.float32) + b
    o_ref[...] = y.astype(o_ref.dtype)


def small_model_forward(x, weight, bias, *, block_b: int = 4096):
    """Forward pass of SmallModel.

    x:      (B, INPUT_SIZE) float32
    weight: (OUTPUT_SIZE, INPUT_SIZE) float32  (torch.nn.Linear layout)
    bias:   (OUTPUT_SIZE,) float32
    returns (B, OUTPUT_SIZE) float32
    """
    B = x.shape[0]

    # One-time layout plumbing outside the hot loop.
    w_t = weight.T                          # (INPUT_SIZE, OUTPUT_SIZE)
    bias2d = bias.reshape(1, OUTPUT_SIZE)   # broadcastable row

    # Batch tile: multiple of 8 (sublane), capped at block_b. Each row of x is
    # only 40 B and each output row 20 B, so even large TB stays far below VMEM.
    tb = min(_round_up(block_b, 8), _round_up(max(B, 1), 8))

    # Pad batch so every grid step sees a full tile (avoids masked partial stores).
    b_pad = _round_up(B, tb)
    if b_pad != B:
        x = jnp.pad(x, ((0, b_pad - B), (0, 0)))

    grid = (b_pad // tb,)

    out = pl.pallas_call(
        linear_kernel,
        out_shape=jax.ShapeDtypeStruct((b_pad, OUTPUT_SIZE), x.dtype),
        grid=grid,
        in_specs=[
            pl.BlockSpec((tb, INPUT_SIZE), lambda i: (i, 0)),
            pl.BlockSpec((INPUT_SIZE, OUTPUT_SIZE), lambda i: (0, 0)),
            pl.BlockSpec((1, OUTPUT_SIZE), lambda i: (0, 0)),
        ],
        out_specs=pl.BlockSpec((tb, OUTPUT_SIZE), lambda i: (i, 0)),
        compiler_params=pltpu.CompilerParams(
            dimension_semantics=("parallel",),   # v7x: shard batch loop over 2 TCs
            vmem_limit_bytes=32 << 20,           # explicit for v7x's smaller VMEM
        ),
    )(x, w_t, bias2d)

    return out[:B]


if __name__ == "__main__":
    key = jax.random.PRNGKey(0)
    kx, kw, kb, kx2 = jax.random.split(key, 4)

    # Deterministic parameter init (mimicking torch.nn.Linear's uniform init bounds).
    bound = 1.0 / (INPUT_SIZE ** 0.5)
    weight = jax.random.uniform(kw, (OUTPUT_SIZE, INPUT_SIZE), dtype=jnp.float32,
                                minval=-bound, maxval=bound)
    bias = jax.random.uniform(kb, (OUTPUT_SIZE,), dtype=jnp.float32,
                              minval=-bound, maxval=bound)

    # Small batch (single tile path).
    batch = 8
    x = jax.random.normal(kx, (batch, INPUT_SIZE), dtype=jnp.float32)
    out = jax.block_until_ready(small_model_forward(x, weight, bias))
    ref = x @ weight.T + bias
    assert out.shape == (batch, OUTPUT_SIZE)
    assert jnp.allclose(out, ref, atol=1e-5, rtol=1e-5)

    # Non-multiple batch with a small tile cap to exercise tiling + padding path.
    batch2 = 100
    x2 = jax.random.normal(kx2, (batch2, INPUT_SIZE), dtype=jnp.float32)
    out2 = jax.block_until_ready(small_model_forward(x2, weight, bias, block_b=32))
    ref2 = x2 @ weight.T + bias
    assert out2.shape == (batch2, OUTPUT_SIZE)
    assert jnp.allclose(out2, ref2, atol=1e-5, rtol=1e-5)

    print("KERNEL_OK")
</pallas_src>

<mosaic_0001>
module attributes {stable_mosaic.version = 11 : i64} {
  func.func @linear_kernel(%arg0: i32, %arg1: memref<8x10xf32, #tpu.memory_space<vmem>>, %arg2: memref<10x5xf32, #tpu.memory_space<vmem>>, %arg3: memref<1x5xf32, #tpu.memory_space<vmem>>, %arg4: memref<8x5xf32, #tpu.memory_space<vmem>>) attributes {dimension_semantics = [#tpu.dimension_semantics<parallel>], iteration_bounds = array<i64: 1>, scalar_prefetch = 0 : i64, scratch_operands = 0 : i64, tpu.core_type = #tpu.core_type<tc>, window_params = [{transform_indices = @transform_0, window_bounds = array<i64: 8, 10>}, {pipeline_mode = #tpu.pipeline_mode<synchronous>, transform_indices = @transform_1, window_bounds = array<i64: 10, 5>}, {pipeline_mode = #tpu.pipeline_mode<synchronous>, transform_indices = @transform_2, window_bounds = array<i64: 1, 5>}, {transform_indices = @transform_3, window_bounds = array<i64: 8, 5>}]} {
    %c0 = arith.constant 0 : index
    %c0_0 = arith.constant 0 : index
    %0 = vector.load %arg1[%c0, %c0_0] : memref<8x10xf32, #tpu.memory_space<vmem>>, vector<8x10xf32>
    %c0_1 = arith.constant 0 : index
    %c0_2 = arith.constant 0 : index
    %1 = vector.load %arg2[%c0_1, %c0_2] : memref<10x5xf32, #tpu.memory_space<vmem>>, vector<10x5xf32>
    %c0_3 = arith.constant 0 : index
    %c0_4 = arith.constant 0 : index
    %2 = vector.load %arg3[%c0_3, %c0_4] : memref<1x5xf32, #tpu.memory_space<vmem>>, vector<1x5xf32>
    %cst = arith.constant dense<0.000000e+00> : vector<8x5xf32>
    %3 = tpu.matmul %0, %1, %cst {dimension_numbers = #tpu.dot_dimension_numbers<[1], [0], [0], [1], [0, 0, 1, 1], [], []>} : vector<8x10xf32>, vector<10x5xf32>, vector<8x5xf32> -> vector<8x5xf32>
    %4 = vector.broadcast %2 : vector<1x5xf32> to vector<8x5xf32>
    %5 = arith.addf %3, %4 : vector<8x5xf32>
    %c0_5 = arith.constant 0 : index
    %c0_6 = arith.constant 0 : index
    %6 = vector.load %arg4[%c0_5, %c0_6] : memref<8x5xf32, #tpu.memory_space<vmem>>, vector<8x5xf32>
    tpu.vector_store %arg4[%c0_5, %c0_6], %5 {strides = array<i32>} : memref<8x5xf32, #tpu.memory_space<vmem>>, vector<8x5xf32>,
    return
  }
  func.func @transform_0(%arg0: i32) -> (i32, i32) {
    %c0_i32 = arith.constant 0 : i32
    %c0_i32_0 = arith.constant 0 : i32
    return %arg0, %c0_i32 : i32, i32
  }
  func.func @transform_1(%arg0: i32) -> (i32, i32) {
    %c0_i32 = arith.constant 0 : i32
    %c0_i32_0 = arith.constant 0 : i32
    %c0_i32_1 = arith.constant 0 : i32
    return %c0_i32, %c0_i32_0 : i32, i32
  }
  func.func @transform_2(%arg0: i32) -> (i32, i32) {
    %c0_i32 = arith.constant 0 : i32
    %c0_i32_0 = arith.constant 0 : i32
    %c0_i32_1 = arith.constant 0 : i32
    return %c0_i32, %c0_i32_0 : i32, i32
  }
  func.func @transform_3(%arg0: i32) -> (i32, i32) {
    %c0_i32 = arith.constant 0 : i32
    %c0_i32_0 = arith.constant 0 : i32
    return %arg0, %c0_i32 : i32, i32
  }
}

</mosaic_0001>

<bundles_post_ra>
// kernel: tpu_custom_call.1
= control target key start
LH: loop header
LB: loop body
LE: loop exit
PB: predicated region body
PF: predicated region fallthrough
CT: control target
= control target key end

     0   :  { %vm26_vm0 = vcmask 1041408   ;;  %vm22_vm1 = vcmask 80896   ;;  %s134_s0 = inlined_call_operand.vmem [shape: f32[8,10], index: 0, kind: input, shape index: {}]   ;;  %s135_s1 = inlined_call_operand.vmem [shape: f32[10,5], index: 1, kind: input, shape index: {}]   ;;  %s136_s2 = inlined_call_operand.vmem [shape: f32[1,5], index: 2, kind: input, shape index: {}]   ;;  %s137_s3 = inlined_call_operand.hbm [shape: f32[8,5], index: 3, kind: output, shape index: {}]  }
   0x1   :  { %v17_v0 = vld [vmem:[%s135_s1 + $0x8] sm:$0x3]  ;;  %v16_v1 = vld [vmem:[%s135_s1] sm:$0xff] }
   0x2   :  { %68 = vmatpush.msk.msra.mxu0 %vm26_vm0, %v17_v0  ;;  %v15_v2 = vld [vmem:[%s134_s0] sm:$0xff] }
   0x3   :  { %8 = vsyncpa [#allocation3], 0  ;;  %v71_v3 = vld [vmem:[%s136_s2] ss:$0 sm:$0xff]  ;;  %s98_s20 = smov [#allocation2]   ;;  %s59_s24 = sshll.u32 %s137_s3, 4  ;;  %s60_s24 = int_to_ptr.hbm [resolvable:$true] %s59_s24 }
   0x4   :  { %45 = vmatpush.msra.mxu0 %v16_v1  ;;  %s57_s21 = sshll.u32 %s98_s20, 4  ;;  %vm50_vm2 = vcmask 39936   ;;  %s58_s21 = int_to_ptr.vmem [resolvable:$true] %s57_s21 }
   0x5   :  { %69 = vmatmul.msk.f32.vlgmr.msra.gmra.mxu0 %vm22_vm1, %v15_v2 }
  0x82   :  { %v47_v4 = vpop.f32.mrf.mxu0 }
  0x83   :  { %v48_v5 = vadd.f32 %v71_v3, %v47_v4 }
  0x85   :  { %51 = vst.msk [vmem:[#allocation2] sm:$0xff] %vm50_vm2, %v48_v5 }
  0x86   :  { %62 = dma.vmem_to_hbm [thread:$0]  %s58_s21, 128, %s60_s24, [#allocation3]  }
  0x87   :  { %96 = dma.done.wait [#allocation3], 128  }
  0x88   :  { %97 = vsyncadd [#allocation3], 4294967168 }
  0x89   :  { %67 = vsyncpa [#allocation3], 1 }

</bundles_post_ra>
